<compile_context>
chip_gen: v6e
topology: v6e:2x2x1
jax: 0.10.0
libtpu: 0.0.40
codegen_flags: <defaults>
</compile_context>

<pallas_src>
import numpy as np
import jax
import jax.numpy as jnp
from jax.experimental import pallas as pl
from jax.experimental.pallas import tpu as pltpu


# ----------------------------------------------------------------------------
# init helper (numpy only, matches the PyTorch module)
# ----------------------------------------------------------------------------
def elup1_inv(x: float) -> float:
    """Inverse of elu+1 (numpy, scalar) — used only for deterministic init."""
    return float(np.log(x)) if x < 1.0 else float(x - 1.0)


# ----------------------------------------------------------------------------
# optional identity kernel boundary (de-emphasized; prefer direct return)
# ----------------------------------------------------------------------------
def _identity_kernel(x_ref, o_ref):
    o_ref[...] = x_ref[...]


def process_noise_forward_pallas(log_process_noise: jax.Array) -> jax.Array:
    """Identity through a pallas_call: dispatch + two tiny DMAs.

    Only for callers that require a kernel boundary.  The recommended path is
    ProcessNoise.__call__, which returns the parameter directly.  No
    input/output aliasing: donating a persistent parameter buffer is a hazard
    and does not remove the DMAs anyway.
    """
    shape = log_process_noise.shape
    return pl.pallas_call(
        _identity_kernel,
        out_shape=jax.ShapeDtypeStruct(shape, log_process_noise.dtype),
        in_specs=[pl.BlockSpec(shape, lambda: (0,) * len(shape))],
        out_specs=pl.BlockSpec(shape, lambda: (0,) * len(shape)),
        grid=(),
    )(log_process_noise)


# ----------------------------------------------------------------------------
# fused downstream consumer: elup1(log_noise) broadcast over batch
# ----------------------------------------------------------------------------
def _elup1_broadcast_kernel(lp_ref, o_ref):
    # lp_ref: (1, lsd)  -- same block every grid step (stays VMEM-resident)
    # o_ref : (tb, lsd) -- one batch tile of the output
    x = lp_ref[...].astype(jnp.float32)                     # f32 compute (v5e-safe)
    y = jnp.where(x >= 0.0, x + 1.0, jnp.exp(x))            # elu(x) + 1 (EUP exp)
    y = y.astype(o_ref.dtype)                               # cast the 1 row, THEN broadcast
    o_ref[...] = jnp.broadcast_to(y, o_ref.shape)           # layout-only broadcast + store


def elup1_covariance_pallas(log_process_noise: jax.Array, batch: int,
                            *, block_rows: int = 1024) -> jax.Array:
    """elup1(log_process_noise) broadcast to (batch, lsd), single fused kernel.

    * No padding, no post-slice: the output block's last dim equals the full
      array dim, so the store path is a (possibly masked) direct store of
      exactly the bytes that are needed.
    * batch is tiled into `block_rows`-row blocks (grid over batch) so large
      batches never exceed VMEM and stores pipeline; the batch axis is marked
      "parallel" so v7x shards it across both TensorCores.

    TODO(synk): in production, fuse this elup1+broadcast directly into the RKN
    predict/covariance kernel that consumes it instead of materializing it.
    """
    _, lsd = log_process_noise.shape
    out_dtype = log_process_noise.dtype

    # Tile the batch axis.  If the whole batch fits in one modest block, use a
    # single block equal to the full dim (always legal).  Otherwise the tile
    # row-count must be sublane-aligned (multiple of 8).
    if batch <= block_rows:
        tb = batch
    else:
        tb = (block_rows // 8) * 8
        tb = max(tb, 8)
    num_blocks = pl.cdiv(batch, tb)

    in_bytes = log_process_noise.dtype.itemsize
    out_bytes = jnp.dtype(out_dtype).itemsize
    cost = pl.CostEstimate(
        flops=2 * lsd,                 # compare + add on the single row
        transcendentals=lsd,           # exp on the single row
        bytes_accessed=lsd * in_bytes + batch * lsd * out_bytes,
    )

    return pl.pallas_call(
        _elup1_broadcast_kernel,
        out_shape=jax.ShapeDtypeStruct((batch, lsd), out_dtype),
        grid=(num_blocks,),
        in_specs=[pl.BlockSpec((1, lsd), lambda i: (0, 0))],
        out_specs=pl.BlockSpec((tb, lsd), lambda i: (i, 0)),
        compiler_params=pltpu.CompilerParams(
            dimension_semantics=("parallel",)),
        cost_estimate=cost,
    )(log_process_noise)


# ----------------------------------------------------------------------------
# module
# ----------------------------------------------------------------------------
class ProcessNoise:
    """JAX/Pallas port of the PyTorch ProcessNoise module.

    forward() == the learnable parameter, so __call__ returns it directly
    (zero kernel launches, zero DMAs — the structurally correct optimization).
    """

    def __init__(self, lsd: int, init_trans_covar: float,
                 num_hidden=None, activation: str = "relu",
                 dtype=jnp.float32):
        self._lsd = lsd
        self._dtype = dtype
        init_trans_cov = elup1_inv(init_trans_covar)
        # nn.init.constant_(torch.empty(1, lsd), init_trans_cov)
        self._log_process_noise = jnp.full((1, self._lsd), init_trans_cov,
                                           dtype=self._dtype)

    def __call__(self) -> jax.Array:
        # Identity forward: return the parameter directly — no pallas_call.
        return self._log_process_noise


# ----------------------------------------------------------------------------
# self-test
# ----------------------------------------------------------------------------
if __name__ == "__main__":
    lsd = 32
    batch = 8
    init_trans_covar = 0.1  # < 1.0 -> elup1_inv uses log branch

    _ = jax.random.PRNGKey(0)  # parameter init is constant; key kept for protocol

    module = ProcessNoise(lsd=lsd, init_trans_covar=init_trans_covar,
                          num_hidden=[64, 64], activation="relu",
                          dtype=jnp.float32)

    ref = np.asarray(module._log_process_noise)
    x = ref.astype(np.float32)
    elup1_ref = np.where(x >= 0.0, x + 1.0, np.exp(x))

    # 1) Primary path: forward() == parameter, returned directly.
    out = jax.block_until_ready(module())
    assert out.shape == (1, lsd) and out.dtype == jnp.float32
    np.testing.assert_allclose(np.asarray(out), ref, rtol=0, atol=0)

    # 2) Optional kernel-boundary path (non-aliased identity) — bit-exact.
    out_k = jax.block_until_ready(process_noise_forward_pallas(module()))
    np.testing.assert_allclose(np.asarray(out_k), ref, rtol=0, atol=0)

    # 3) Fused downstream consumer, single-block path (batch fits one tile).
    covar = jax.block_until_ready(elup1_covariance_pallas(module(), batch))
    assert covar.shape == (batch, lsd) and covar.dtype == jnp.float32
    np.testing.assert_allclose(np.asarray(covar),
                               np.broadcast_to(elup1_ref, (batch, lsd)),
                               rtol=1e-6, atol=1e-6)

    # 4) Tiled path (grid over batch, parallel semantics) with a small tile.
    batch_big = 24
    covar_t = jax.block_until_ready(
        elup1_covariance_pallas(module(), batch_big, block_rows=8))
    assert covar_t.shape == (batch_big, lsd)
    np.testing.assert_allclose(np.asarray(covar_t),
                               np.broadcast_to(elup1_ref, (batch_big, lsd)),
                               rtol=1e-6, atol=1e-6)

    print("KERNEL_OK")
</pallas_src>

<mosaic_0001>
module attributes {stable_mosaic.version = 11 : i64} {
  func.func @_identity_kernel(%arg0: memref<1x32xf32, #tpu.memory_space<vmem>>, %arg1: memref<1x32xf32, #tpu.memory_space<vmem>>) attributes {dimension_semantics = [], scalar_prefetch = 0 : i64, scratch_operands = 0 : i64, tpu.core_type = #tpu.core_type<tc>} {
    %c0 = arith.constant 0 : index
    %c0_0 = arith.constant 0 : index
    %0 = vector.load %arg0[%c0, %c0_0] : memref<1x32xf32, #tpu.memory_space<vmem>>, vector<1x32xf32>
    %c0_1 = arith.constant 0 : index
    %c0_2 = arith.constant 0 : index
    %1 = vector.load %arg1[%c0_1, %c0_2] : memref<1x32xf32, #tpu.memory_space<vmem>>, vector<1x32xf32>
    tpu.vector_store %arg1[%c0_1, %c0_2], %0 {strides = array<i32>} : memref<1x32xf32, #tpu.memory_space<vmem>>, vector<1x32xf32>,
    return
  }
}

</mosaic_0001>

<bundles_post_ra>
// kernel: tpu_custom_call.1
= control target key start
LH: loop header
LB: loop body
LE: loop exit
PB: predicated region body
PF: predicated region fallthrough
CT: control target
= control target key end

     0   :  { %6 = vsyncpa [#allocation3], 0  ;;  %s103_s0 = inlined_call_operand.hbm [shape: f32[1,32], index: 0, kind: input, shape index: {}]   ;;  %s104_s1 = inlined_call_operand.hbm [shape: f32[1,32], index: 1, kind: output, shape index: {}]  }
   0x1   :  { %7 = vsyncpa [#allocation4], 0  ;;  %s85_s6 = smov [#allocation2]  }
   0x2   :  { %s14_s7 = sshll.u32 %s85_s6, 4  ;;  %s15_s7 = int_to_ptr.vmem [resolvable:$true] %s14_s7 }
   0x3   :  { %s49_s8 = scalar_lea.vmem %s15_s7, 16  ;;  %s53_s9 = scalar_lea.vmem %s15_s7, 32 }
   0x4   :  { %p50_p0 = scmp.ne.s32.totalorder %s15_s7, %s49_s8  ;;  %p54_p1 = scmp.lt.s32.totalorder %s15_s7, %s15_s7 }
   0x5   :  { %p55_p2 = scmp.lt.s32.totalorder %s53_s9, %s49_s8 }
   0x7   :  { %p56_p3 = por %p55_p2, %p54_p1 }
   0x9   :  { %p57_p4 = pnand %p56_p3, %p50_p0 }
   0xb   :  { %60 = shalt.err (!%p57_p4)
}
   0xc   :  { %17 = dma.hbm_to_vmem [thread:$0]  %s103_s0, 16, %s15_s7, [#allocation3]  }
   0xd   :  { %81 = dma.done.wait [#allocation3], 16  }
   0xe   :  { %82 = vsyncadd [#allocation3], 4294967280  ;;  %s86_s12 = smov [#allocation5]   ;;  %vm22_vm0 = vcmask 253952   ;;  %v21_v0 = vld [vmem:[#allocation2] sm:$0x1] }
   0xf   :  { %s30_s13 = sshll.u32 %s86_s12, 4  ;;  %23 = vst.msk [vmem:[#allocation5] sm:$0x1] %vm22_vm0, %v21_v0  ;;  %s31_s13 = int_to_ptr.vmem [resolvable:$true] %s30_s13 }
  0x10   :  { %s61_s14 = scalar_lea.vmem %s31_s13, 16  ;;  %s65_s15 = scalar_lea.vmem %s31_s13, 32 }
  0x11   :  { %p62_p5 = scmp.ne.s32.totalorder %s31_s13, %s61_s14  ;;  %p66_p6 = scmp.lt.s32.totalorder %s31_s13, %s31_s13 }
  0x12   :  { %p67_p7 = scmp.lt.s32.totalorder %s65_s15, %s61_s14 }
  0x14   :  { %p68_p8 = por %p67_p7, %p66_p6 }
  0x16   :  { %p69_p9 = pnand %p68_p8, %p62_p5 }
  0x18   :  { %72 = shalt.err (!%p69_p9)
}
  0x19   :  { %33 = dma.vmem_to_hbm [thread:$0]  %s31_s13, 16, %s104_s1, [#allocation4]  }
  0x1a   :  { %83 = dma.done.wait [#allocation4], 16  }
  0x1b   :  { %84 = vsyncadd [#allocation4], 4294967280 }
  0x1c   :  { %37 = vsyncpa [#allocation3], 1 }
  0x1d   :  { %38 = vsyncpa [#allocation4], 1 }

</bundles_post_ra>
